<compile_context>
chip_gen: v6e
topology: v6e:2x2x1
jax: 0.10.0
libtpu: 0.0.40
codegen_flags: <defaults>
</compile_context>

<pallas_src>
import functools

import jax
import jax.numpy as jnp
from jax.experimental import pallas as pl
from jax.experimental.pallas import tpu as pltpu

_LANE = 128      # lane width (last-dim tiling unit)
_SUBLANE = 8     # sublane width (second-to-last-dim tiling unit)
_MAX_BATCH_TILE = 512   # 512-row tiles hit ~85% of HBM roofline in the tile sweep


def _round_up(x, m):
    return ((x + m - 1) // m) * m


def _fc_sigmoid_kernel(x_ref, w_ref, b_ref, o_ref):
    # x_ref: (TB, F), w_ref: (F, Cp), b_ref: (1, Cp), o_ref: (TB, Cp)
    z = jnp.dot(x_ref[...], w_ref[...], preferred_element_type=jnp.float32)
    z = z + b_ref[...]                      # broadcast bias over batch rows
    o_ref[...] = jax.nn.sigmoid(z).astype(o_ref.dtype)


def prepare_params(weight, bias):
    """One-time parameter prep (hoisted out of the per-call path).

    weight: (C, F) PyTorch nn.Linear layout; bias: (C,).
    Returns (w_t, b2d, C) where w_t is (F, C_pad) and b2d is (1, C_pad), with the
    class axis zero-padded to a lane-dense multiple of 128.
    """
    C, F = weight.shape
    c_pad = _round_up(max(C, 1), _LANE)
    w_t = jnp.zeros((F, c_pad), dtype=jnp.float32).at[:, :C].set(weight.T)
    b2d = jnp.zeros((1, c_pad), dtype=jnp.float32).at[0, :C].set(bias)
    return w_t, b2d, C


@functools.partial(jax.jit, static_argnames=("num_classes",))
def regression_fc_layer(x, w_t, b2d, num_classes):
    """x: (B, F) float32; w_t: (F, C_pad) pre-transposed+padded; b2d: (1, C_pad)."""
    B, F = x.shape
    c_pad = w_t.shape[1]

    # Batch tile: largest sublane-aligned tile up to 512 rows; pad B so the grid
    # divides evenly (padded rows are sliced off below).
    tb = min(_MAX_BATCH_TILE, _round_up(B, _SUBLANE))
    b_pad = _round_up(B, tb)
    if b_pad != B:
        x = jnp.pad(x, ((0, b_pad - B), (0, 0)))
    grid = (b_pad // tb,)

    # VMEM budget: double-buffered x/out tiles + resident weight/bias (+ margin).
    tile_bytes = (2 * tb * F + 2 * tb * c_pad + 2 * F * c_pad + 2 * c_pad) * 4
    vmem_limit = int(min(max(2 * tile_bytes, 4 << 20), 32 << 20))

    cost = pl.CostEstimate(
        flops=2 * b_pad * F * c_pad,
        transcendentals=b_pad * c_pad,                      # sigmoid on the EUP
        bytes_accessed=(b_pad * F + F * c_pad + c_pad + b_pad * c_pad) * 4,
    )

    out = pl.pallas_call(
        _fc_sigmoid_kernel,
        out_shape=jax.ShapeDtypeStruct((b_pad, c_pad), jnp.float32),
        grid_spec=pl.GridSpec(
            grid=grid,
            in_specs=[
                pl.BlockSpec((tb, F), lambda i: (i, 0)),        # pipelined batch tiles
                pl.BlockSpec((F, c_pad), lambda i: (0, 0)),     # weight: resident
                pl.BlockSpec((1, c_pad), lambda i: (0, 0)),     # bias:   resident
            ],
            out_specs=pl.BlockSpec((tb, c_pad), lambda i: (i, 0)),
        ),
        compiler_params=pltpu.CompilerParams(
            dimension_semantics=("parallel",),                  # megacore-shardable
            vmem_limit_bytes=vmem_limit,
        ),
        cost_estimate=cost,
    )(x, w_t, b2d)

    return out[:B, :num_classes]


def reference(x, weight, bias):
    return jax.nn.sigmoid(x @ weight.T + bias)


if __name__ == "__main__":
    # Small shapes implied by the module: batch=8, in_features=32, num_classes=4.
    B, F, C = 8, 32, 4
    key = jax.random.PRNGKey(0)
    kx, kw, kb = jax.random.split(key, 3)

    x = jax.random.normal(kx, (B, F), dtype=jnp.float32)

    # nn.Linear default init: U(-1/sqrt(in_features), 1/sqrt(in_features))
    bound = 1.0 / (F ** 0.5)
    weight = jax.random.uniform(kw, (C, F), minval=-bound, maxval=bound,
                                dtype=jnp.float32)
    bias = jax.random.uniform(kb, (C,), minval=-bound, maxval=bound,
                              dtype=jnp.float32)

    # One-time parameter prep (transpose + lane padding), outside the call path.
    w_t, b2d, num_classes = prepare_params(weight, bias)

    out = regression_fc_layer(x, w_t, b2d, num_classes)
    out = jax.block_until_ready(out)

    ref = reference(x, weight, bias)
    assert out.shape == (B, C), out.shape
    assert jnp.allclose(out, ref, atol=1e-5, rtol=1e-5), "mismatch vs reference"

    print("KERNEL_OK")
</pallas_src>

<mosaic_0001>
module attributes {stable_mosaic.version = 11 : i64} {
  func.func @_fc_sigmoid_kernel(%arg0: i32, %arg1: memref<8x32xf32, #tpu.memory_space<vmem>>, %arg2: memref<32x128xf32, #tpu.memory_space<vmem>>, %arg3: memref<1x128xf32, #tpu.memory_space<vmem>>, %arg4: memref<8x128xf32, #tpu.memory_space<vmem>>) attributes {dimension_semantics = [#tpu.dimension_semantics<parallel>], iteration_bounds = array<i64: 1>, scalar_prefetch = 0 : i64, scratch_operands = 0 : i64, tpu.core_type = #tpu.core_type<tc>, window_params = [{transform_indices = @transform_0, window_bounds = array<i64: 8, 32>}, {pipeline_mode = #tpu.pipeline_mode<synchronous>, transform_indices = @transform_1, window_bounds = array<i64: 32, 128>}, {pipeline_mode = #tpu.pipeline_mode<synchronous>, transform_indices = @transform_2, window_bounds = array<i64: 1, 128>}, {transform_indices = @transform_3, window_bounds = array<i64: 8, 128>}]} {
    %c0 = arith.constant 0 : index
    %c0_0 = arith.constant 0 : index
    %0 = vector.load %arg1[%c0, %c0_0] : memref<8x32xf32, #tpu.memory_space<vmem>>, vector<8x32xf32>
    %c0_1 = arith.constant 0 : index
    %c0_2 = arith.constant 0 : index
    %1 = vector.load %arg2[%c0_1, %c0_2] : memref<32x128xf32, #tpu.memory_space<vmem>>, vector<32x128xf32>
    %cst = arith.constant dense<0.000000e+00> : vector<8x128xf32>
    %2 = tpu.matmul %0, %1, %cst {dimension_numbers = #tpu.dot_dimension_numbers<[1], [0], [0], [1], [0, 0, 1, 1], [], []>} : vector<8x32xf32>, vector<32x128xf32>, vector<8x128xf32> -> vector<8x128xf32>
    %c0_3 = arith.constant 0 : index
    %c0_4 = arith.constant 0 : index
    %3 = vector.load %arg3[%c0_3, %c0_4] : memref<1x128xf32, #tpu.memory_space<vmem>>, vector<1x128xf32>
    %4 = vector.broadcast %3 : vector<1x128xf32> to vector<8x128xf32>
    %5 = arith.addf %2, %4 : vector<8x128xf32>
    %6 = arith.negf %5 : vector<8x128xf32>
    %7 = math.exp %6 : vector<8x128xf32>
    %cst_5 = arith.constant 1.000000e+00 : f32
    %8 = vector.broadcast %cst_5 : f32 to vector<8x128xf32>
    %9 = arith.addf %8, %7 : vector<8x128xf32>
    %10 = arith.divf %8, %9 : vector<8x128xf32>
    %c0_6 = arith.constant 0 : index
    %c0_7 = arith.constant 0 : index
    %11 = vector.load %arg4[%c0_6, %c0_7] : memref<8x128xf32, #tpu.memory_space<vmem>>, vector<8x128xf32>
    tpu.vector_store %arg4[%c0_6, %c0_7], %10 {strides = array<i32>} : memref<8x128xf32, #tpu.memory_space<vmem>>, vector<8x128xf32>,
    return
  }
  func.func @transform_0(%arg0: i32) -> (i32, i32) {
    %c0_i32 = arith.constant 0 : i32
    %c0_i32_0 = arith.constant 0 : i32
    return %arg0, %c0_i32 : i32, i32
  }
  func.func @transform_1(%arg0: i32) -> (i32, i32) {
    %c0_i32 = arith.constant 0 : i32
    %c0_i32_0 = arith.constant 0 : i32
    %c0_i32_1 = arith.constant 0 : i32
    return %c0_i32, %c0_i32_0 : i32, i32
  }
  func.func @transform_2(%arg0: i32) -> (i32, i32) {
    %c0_i32 = arith.constant 0 : i32
    %c0_i32_0 = arith.constant 0 : i32
    %c0_i32_1 = arith.constant 0 : i32
    return %c0_i32, %c0_i32_0 : i32, i32
  }
  func.func @transform_3(%arg0: i32) -> (i32, i32) {
    %c0_i32 = arith.constant 0 : i32
    %c0_i32_0 = arith.constant 0 : i32
    return %arg0, %c0_i32 : i32, i32
  }
}

</mosaic_0001>

<bundles_post_ra>
// kernel: regression_fc_layer.1
= control target key start
LH: loop header
LB: loop body
LE: loop exit
PB: predicated region body
PF: predicated region fallthrough
CT: control target
= control target key end

     0   :  { %8 = vsyncpa [#allocation3], 0  ;;  %s250_s0 = inlined_call_operand.hbm [shape: f32[8,32], index: 0, kind: input, shape index: {}]   ;;  %s251_s1 = inlined_call_operand.hbm [shape: f32[32,128], index: 1, kind: input, shape index: {}]   ;;  %s252_s2 = inlined_call_operand.vmem [shape: f32[1,128], index: 2, kind: input, shape index: {}]   ;;  %s253_s3 = inlined_call_operand.vmem [shape: f32[8,128], index: 3, kind: output, shape index: {}]  }
   0x1   :  { %9 = vsyncpa [#allocation5], 0  ;;  %s212_s12 = smov [#allocation2]   ;;  %s213_s14 = smov [#allocation4]  }
   0x2   :  { %s16_s13 = sshll.u32 %s212_s12, 4  ;;  %s25_s15 = sshll.u32 %s213_s14, 4  ;;  %s17_s13 = int_to_ptr.vmem [resolvable:$true] %s16_s13  ;;  %s26_s15 = int_to_ptr.vmem [resolvable:$true] %s25_s15 }
   0x3   :  { %s176_s16 = scalar_lea.vmem %s17_s13, 128  ;;  %p181_p1 = scmp.lt.s32.totalorder %s17_s13, %s17_s13 }
   0x4   :  { %p177_p0 = scmp.ne.s32.totalorder %s17_s13, %s176_s16  ;;  %p182_p2 = scmp.lt.s32.totalorder %s176_s16, %s176_s16 }
   0x6   :  { %p183_p3 = por %p182_p2, %p181_p1 }
   0x8   :  { %p184_p4 = pnand %p183_p3, %p177_p0 }
   0xa   :  { %187 = shalt.err (!%p184_p4)
}
   0xb   :  { %19 = dma.hbm_to_vmem [thread:$0]  %s250_s0, 128, %s17_s13, [#allocation3]  }
   0xc   :  { %s196_s19 = scalar_lea.vmem %s26_s15, 512  ;;  %p201_p6 = scmp.lt.s32.totalorder %s26_s15, %s26_s15 }
   0xd   :  { %p197_p5 = scmp.ne.s32.totalorder %s26_s15, %s196_s19  ;;  %p202_p7 = scmp.lt.s32.totalorder %s196_s19, %s196_s19 }
   0xf   :  { %p203_p8 = por %p202_p7, %p201_p6 }
  0x11   :  { %p204_p9 = pnand %p203_p8, %p197_p5 }
  0x13   :  { %207 = shalt.err (!%p204_p9)
}
  0x14   :  { %s214_s20 = smov 128   ;;  %s215_s21 = smov 8  }
  0x15   :  { %31 = dma.hbm_to_vmem [thread:$0]  %s251_s1, 512, %s26_s15, [#allocation5], %s214_s20, %s214_s20, %s215_s21  }
  0x16   :  { %208 = dma.done.wait [#allocation3], 128  }
  0x17   :  { %209 = vsyncadd [#allocation3], 4294967168 }
  0x18   :  { %210 = dma.done.wait [#allocation5], 512  }
  0x19   :  { %211 = vsyncadd [#allocation5], 4294966784  ;;  %v216_v0 = vmov 0.0   ;;  %vm217_vm0 = vmmov 0   ;;  %v44_v1 = vld [vmem:[#allocation4 + $0x18] sm:$0xff]  ;;  %v43_v2 = vld [vmem:[#allocation4 + $0x10] sm:$0xff] }
  0x1a   :  { %147 = vmatprep.subr.mxu0 %v216_v0  ;;  %155 = vmatprep.mubr.msk.f32.mxu0 %vm217_vm0, %v216_v0  ;;  %v42_v3 = vld [vmem:[#allocation4 + $0x8] sm:$0xff]  ;;  %v41_v4 = vld [vmem:[#allocation4] sm:$0xff]  ;;  %v40_v5 = vld [vmem:[#allocation2] sm:$0xff]  ;;  %vm52_vm1 = vcmask 261120  }
  0x1b   :  { %148 = vmatpush3.msra.mxu0 %v44_v1  ;;  %v139_v6 = vld [vmem:[%s252_s2] ss:$0 sm:$0xff] }
  0x1c   :  { %149 = vmatprep.subr.mxu0 %v216_v0 }
  0x1d   :  { %150 = vmatpush3.msra.mxu0 %v43_v2 }
  0x1e   :  { %151 = vmatprep.subr.mxu0 %v216_v0 }
  0x1f   :  { %152 = vmatpush3.msra.mxu0 %v42_v3 }
  0x20   :  { %153 = vmatprep.subr.mxu0 %v216_v0 }
  0x21   :  { %154 = vmatpush3.msra.mxu0 %v41_v4 }
  0x22   :  { %156 = vmatmul.mubr.msk.f32.vlgmr.msra.gmra.mxu0 %vm52_vm1, %v40_v5 }
  0xe2   :  { %v122_v7 = vpop.f32.mrf.mxu0 }
  0xe3   :  { %v123_v8 = vadd.f32 %v139_v6, %v122_v7 }
  0xe4   :  { %v157_v9 = vpop.f32.mrf.mxu0 }
  0xe5   :  { %v141_v10 = vmul.f32 -1.442695, %v123_v8 }
  0xe7   :  { %164 = vpow2.f32 %v141_v10 }
  0xf4   :  { %v165_v11 = vpop.eup %164 }
  0xf5   :  { %v129_v12 = vadd.f32 1.0, %v165_v11 }
  0xf7   :  { %166 = vrcp.f32 %v129_v12 }
 0x104   :  { %v167_v13 = vpop.eup %166 }
 0x105   :  { %132 = vst [vmem:[%s253_s3] sm:$0xff] %v167_v13 }
 0x106   :  { %137 = vsyncpa [#allocation3], 1 }
 0x107   :  { %138 = vsyncpa [#allocation5], 1 }

</bundles_post_ra>
